<compile_context>
chip_gen: v7x
topology: tpu7x:2x2x1
jax: 0.10.0
libtpu: 0.0.40
codegen_flags: <defaults>
</compile_context>

<pallas_src>
import numpy as np
import jax
import jax.numpy as jnp
from jax.experimental import pallas as pl
from jax.experimental.pallas import tpu as pltpu


def _round_up(n, m):
    return ((n + m - 1) // m) * m


def bp_kernel(w1_ref, b1_ref, w2_ref, b2_ref, w3_ref, b3_ref, x_ref, o_ref):
    """Entire 3-layer MLP on VPU/EUP. x_ref: (2, TB) with batch on lanes,
    o_ref: (1, TB). Weights (out, in) and biases (out,) are scalars in SMEM."""

    def sigmoid(z):
        # one EUP op instead of exp + full-precision divide
        return 0.5 * (jnp.tanh(0.5 * z) + 1.0)

    x0 = x_ref[0:1, :]  # (1, TB)
    x1 = x_ref[1:2, :]  # (1, TB)

    # fc1: 2 -> 3   (scalar-broadcast MACs over the lane-dense batch)
    h1 = [
        sigmoid(w1_ref[o, 0] * x0 + w1_ref[o, 1] * x1 + b1_ref[o])
        for o in range(3)
    ]
    # fc2: 3 -> 3
    h2 = [
        sigmoid(
            w2_ref[o, 0] * h1[0]
            + w2_ref[o, 1] * h1[1]
            + w2_ref[o, 2] * h1[2]
            + b2_ref[o]
        )
        for o in range(3)
    ]
    # fc3: 3 -> 1
    out = sigmoid(
        w3_ref[0, 0] * h2[0]
        + w3_ref[0, 1] * h2[1]
        + w3_ref[0, 2] * h2[2]
        + b3_ref[0]
    )
    o_ref[...] = out.astype(o_ref.dtype)


def bp_forward(x, params, block_b=512):
    """x: (B, 2) float32. Returns (B, 1) float32, matching BP.forward."""
    w1, b1, w2, b2, w3, b3 = params
    B = x.shape[0]
    # Lane-dense batch block: multiple of 128, capped at block_b.
    tb = min(block_b, _round_up(B, 128))
    b_pad = _round_up(B, tb)

    # Layout plumbing in the wrapper: transpose so batch sits on lanes,
    # pad batch up to a whole number of blocks (padding is sliced off below).
    xt = jnp.pad(x.astype(jnp.float32).T, ((0, 0), (0, b_pad - B)))

    smem_spec = pl.BlockSpec(memory_space=pltpu.MemorySpace.SMEM)
    out_pad = pl.pallas_call(
        bp_kernel,
        out_shape=jax.ShapeDtypeStruct((1, b_pad), jnp.float32),
        grid=(b_pad // tb,),
        in_specs=[smem_spec] * 6
        + [pl.BlockSpec((2, tb), lambda i: (0, i))],
        out_specs=pl.BlockSpec((1, tb), lambda i: (0, i)),
        compiler_params=pltpu.CompilerParams(
            dimension_semantics=("parallel",)  # megacore sharding on v7x
        ),
    )(w1, b1, w2, b2, w3, b3, xt)

    return out_pad[:, :B].T  # (B, 1)


def init_params(key):
    """PyTorch nn.Linear default init: U(-1/sqrt(fan_in), 1/sqrt(fan_in)).
    Weights stored PyTorch-style as (out_features, in_features), biases (out,)."""
    dims = [(3, 2), (3, 3), (1, 3)]  # (out, in) for fc1, fc2, fc3
    params = []
    for fan_out, fan_in in dims:
        key, kw, kb = jax.random.split(key, 3)
        bound = 1.0 / np.sqrt(fan_in)
        w = jax.random.uniform(kw, (fan_out, fan_in), jnp.float32, -bound, bound)
        b = jax.random.uniform(kb, (fan_out,), jnp.float32, -bound, bound)
        params.extend([w, b])
    return tuple(params)


def bp_reference(x, params):
    w1, b1, w2, b2, w3, b3 = params
    h1 = jax.nn.sigmoid(x @ w1.T + b1)
    h2 = jax.nn.sigmoid(h1 @ w2.T + b2)
    return jax.nn.sigmoid(h2 @ w3.T + b3)


if __name__ == "__main__":
    key = jax.random.PRNGKey(0)
    params = init_params(key)

    # 1) XOR-style input: batch of 4 samples, 2 features each.
    x = jnp.array([[0.0, 0.0], [0.0, 1.0], [1.0, 0.0], [1.0, 1.0]],
                  dtype=jnp.float32)
    out = jax.block_until_ready(bp_forward(x, params))
    ref = bp_reference(x, params)
    assert out.shape == (4, 1)
    np.testing.assert_allclose(np.asarray(out), np.asarray(ref),
                               rtol=1e-5, atol=1e-5)

    # 2) Larger batch to exercise padding + multi-block grid pipelining.
    key, kx = jax.random.split(key)
    x_big = jax.random.uniform(kx, (600, 2), jnp.float32)
    out_big = jax.block_until_ready(bp_forward(x_big, params))
    ref_big = bp_reference(x_big, params)
    assert out_big.shape == (600, 1)
    np.testing.assert_allclose(np.asarray(out_big), np.asarray(ref_big),
                               rtol=1e-5, atol=1e-5)

    print("KERNEL_OK")
</pallas_src>

<mosaic_0001>
module attributes {stable_mosaic.version = 11 : i64} {
  func.func @bp_kernel(%arg0: i32, %arg1: memref<3x2xf32, #tpu.memory_space<smem>>, %arg2: memref<3xf32, #tpu.memory_space<smem>>, %arg3: memref<3x3xf32, #tpu.memory_space<smem>>, %arg4: memref<3xf32, #tpu.memory_space<smem>>, %arg5: memref<1x3xf32, #tpu.memory_space<smem>>, %arg6: memref<1xf32, #tpu.memory_space<smem>>, %arg7: memref<2x128xf32, #tpu.memory_space<vmem>>, %arg8: memref<1x128xf32, #tpu.memory_space<vmem>>) attributes {dimension_semantics = [#tpu.dimension_semantics<parallel>], iteration_bounds = array<i64: 1>, scalar_prefetch = 0 : i64, scratch_operands = 0 : i64, tpu.core_type = #tpu.core_type<tc>, window_params = [{transform_indices = @transform_0, window_bounds = array<i64: 3, 2>}, {transform_indices = @transform_1, window_bounds = array<i64: 3>}, {transform_indices = @transform_2, window_bounds = array<i64: 3, 3>}, {transform_indices = @transform_3, window_bounds = array<i64: 3>}, {transform_indices = @transform_4, window_bounds = array<i64: 1, 3>}, {transform_indices = @transform_5, window_bounds = array<i64: 1>}, {transform_indices = @transform_6, window_bounds = array<i64: 2, 128>}, {transform_indices = @transform_7, window_bounds = array<i64: 1, 128>}]} {
    %c0 = arith.constant 0 : index
    %c0_0 = arith.constant 0 : index
    %0 = vector.load %arg7[%c0, %c0_0] : memref<2x128xf32, #tpu.memory_space<vmem>>, vector<1x128xf32>
    %c1 = arith.constant 1 : index
    %c0_1 = arith.constant 0 : index
    %1 = vector.load %arg7[%c1, %c0_1] : memref<2x128xf32, #tpu.memory_space<vmem>>, vector<1x128xf32>
    %c0_2 = arith.constant 0 : index
    %c0_3 = arith.constant 0 : index
    %2 = memref.load %arg1[%c0_2, %c0_3] : memref<3x2xf32, #tpu.memory_space<smem>>
    %3 = vector.broadcast %2 : f32 to vector<1x128xf32>
    %4 = arith.mulf %3, %0 : vector<1x128xf32>
    %c0_4 = arith.constant 0 : index
    %c1_5 = arith.constant 1 : index
    %5 = memref.load %arg1[%c0_4, %c1_5] : memref<3x2xf32, #tpu.memory_space<smem>>
    %6 = vector.broadcast %5 : f32 to vector<1x128xf32>
    %7 = arith.mulf %6, %1 : vector<1x128xf32>
    %8 = arith.addf %4, %7 : vector<1x128xf32>
    %c0_6 = arith.constant 0 : index
    %9 = memref.load %arg2[%c0_6] : memref<3xf32, #tpu.memory_space<smem>>
    %10 = vector.broadcast %9 : f32 to vector<1x128xf32>
    %11 = arith.addf %8, %10 : vector<1x128xf32>
    %cst = arith.constant 5.000000e-01 : f32
    %12 = vector.broadcast %cst : f32 to vector<1x128xf32>
    %13 = arith.mulf %12, %11 : vector<1x128xf32>
    %14 = math.tanh %13 : vector<1x128xf32>
    %cst_7 = arith.constant 1.000000e+00 : f32
    %15 = vector.broadcast %cst_7 : f32 to vector<1x128xf32>
    %16 = arith.addf %14, %15 : vector<1x128xf32>
    %cst_8 = arith.constant 5.000000e-01 : f32
    %17 = vector.broadcast %cst_8 : f32 to vector<1x128xf32>
    %18 = arith.mulf %17, %16 : vector<1x128xf32>
    %c1_9 = arith.constant 1 : index
    %c0_10 = arith.constant 0 : index
    %19 = memref.load %arg1[%c1_9, %c0_10] : memref<3x2xf32, #tpu.memory_space<smem>>
    %20 = vector.broadcast %19 : f32 to vector<1x128xf32>
    %21 = arith.mulf %20, %0 : vector<1x128xf32>
    %c1_11 = arith.constant 1 : index
    %c1_12 = arith.constant 1 : index
    %22 = memref.load %arg1[%c1_11, %c1_12] : memref<3x2xf32, #tpu.memory_space<smem>>
    %23 = vector.broadcast %22 : f32 to vector<1x128xf32>
    %24 = arith.mulf %23, %1 : vector<1x128xf32>
    %25 = arith.addf %21, %24 : vector<1x128xf32>
    %c1_13 = arith.constant 1 : index
    %26 = memref.load %arg2[%c1_13] : memref<3xf32, #tpu.memory_space<smem>>
    %27 = vector.broadcast %26 : f32 to vector<1x128xf32>
    %28 = arith.addf %25, %27 : vector<1x128xf32>
    %cst_14 = arith.constant 5.000000e-01 : f32
    %29 = vector.broadcast %cst_14 : f32 to vector<1x128xf32>
    %30 = arith.mulf %29, %28 : vector<1x128xf32>
    %31 = math.tanh %30 : vector<1x128xf32>
    %cst_15 = arith.constant 1.000000e+00 : f32
    %32 = vector.broadcast %cst_15 : f32 to vector<1x128xf32>
    %33 = arith.addf %31, %32 : vector<1x128xf32>
    %cst_16 = arith.constant 5.000000e-01 : f32
    %34 = vector.broadcast %cst_16 : f32 to vector<1x128xf32>
    %35 = arith.mulf %34, %33 : vector<1x128xf32>
    %c2 = arith.constant 2 : index
    %c0_17 = arith.constant 0 : index
    %36 = memref.load %arg1[%c2, %c0_17] : memref<3x2xf32, #tpu.memory_space<smem>>
    %37 = vector.broadcast %36 : f32 to vector<1x128xf32>
    %38 = arith.mulf %37, %0 : vector<1x128xf32>
    %c2_18 = arith.constant 2 : index
    %c1_19 = arith.constant 1 : index
    %39 = memref.load %arg1[%c2_18, %c1_19] : memref<3x2xf32, #tpu.memory_space<smem>>
    %40 = vector.broadcast %39 : f32 to vector<1x128xf32>
    %41 = arith.mulf %40, %1 : vector<1x128xf32>
    %42 = arith.addf %38, %41 : vector<1x128xf32>
    %c2_20 = arith.constant 2 : index
    %43 = memref.load %arg2[%c2_20] : memref<3xf32, #tpu.memory_space<smem>>
    %44 = vector.broadcast %43 : f32 to vector<1x128xf32>
    %45 = arith.addf %42, %44 : vector<1x128xf32>
    %cst_21 = arith.constant 5.000000e-01 : f32
    %46 = vector.broadcast %cst_21 : f32 to vector<1x128xf32>
    %47 = arith.mulf %46, %45 : vector<1x128xf32>
    %48 = math.tanh %47 : vector<1x128xf32>
    %cst_22 = arith.constant 1.000000e+00 : f32
    %49 = vector.broadcast %cst_22 : f32 to vector<1x128xf32>
    %50 = arith.addf %48, %49 : vector<1x128xf32>
    %cst_23 = arith.constant 5.000000e-01 : f32
    %51 = vector.broadcast %cst_23 : f32 to vector<1x128xf32>
    %52 = arith.mulf %51, %50 : vector<1x128xf32>
    %c0_24 = arith.constant 0 : index
    %c0_25 = arith.constant 0 : index
    %53 = memref.load %arg3[%c0_24, %c0_25] : memref<3x3xf32, #tpu.memory_space<smem>>
    %54 = vector.broadcast %53 : f32 to vector<1x128xf32>
    %55 = arith.mulf %54, %18 : vector<1x128xf32>
    %c0_26 = arith.constant 0 : index
    %c1_27 = arith.constant 1 : index
    %56 = memref.load %arg3[%c0_26, %c1_27] : memref<3x3xf32, #tpu.memory_space<smem>>
    %57 = vector.broadcast %56 : f32 to vector<1x128xf32>
    %58 = arith.mulf %57, %35 : vector<1x128xf32>
    %59 = arith.addf %55, %58 : vector<1x128xf32>
    %c0_28 = arith.constant 0 : index
    %c2_29 = arith.constant 2 : index
    %60 = memref.load %arg3[%c0_28, %c2_29] : memref<3x3xf32, #tpu.memory_space<smem>>
    %61 = vector.broadcast %60 : f32 to vector<1x128xf32>
    %62 = arith.mulf %61, %52 : vector<1x128xf32>
    %63 = arith.addf %59, %62 : vector<1x128xf32>
    %c0_30 = arith.constant 0 : index
    %64 = memref.load %arg4[%c0_30] : memref<3xf32, #tpu.memory_space<smem>>
    %65 = vector.broadcast %64 : f32 to vector<1x128xf32>
    %66 = arith.addf %63, %65 : vector<1x128xf32>
    %cst_31 = arith.constant 5.000000e-01 : f32
    %67 = vector.broadcast %cst_31 : f32 to vector<1x128xf32>
    %68 = arith.mulf %67, %66 : vector<1x128xf32>
    %69 = math.tanh %68 : vector<1x128xf32>
    %cst_32 = arith.constant 1.000000e+00 : f32
    %70 = vector.broadcast %cst_32 : f32 to vector<1x128xf32>
    %71 = arith.addf %69, %70 : vector<1x128xf32>
    %cst_33 = arith.constant 5.000000e-01 : f32
    %72 = vector.broadcast %cst_33 : f32 to vector<1x128xf32>
    %73 = arith.mulf %72, %71 : vector<1x128xf32>
    %c1_34 = arith.constant 1 : index
    %c0_35 = arith.constant 0 : index
    %74 = memref.load %arg3[%c1_34, %c0_35] : memref<3x3xf32, #tpu.memory_space<smem>>
    %75 = vector.broadcast %74 : f32 to vector<1x128xf32>
    %76 = arith.mulf %75, %18 : vector<1x128xf32>
    %c1_36 = arith.constant 1 : index
    %c1_37 = arith.constant 1 : index
    %77 = memref.load %arg3[%c1_36, %c1_37] : memref<3x3xf32, #tpu.memory_space<smem>>
    %78 = vector.broadcast %77 : f32 to vector<1x128xf32>
    %79 = arith.mulf %78, %35 : vector<1x128xf32>
    %80 = arith.addf %76, %79 : vector<1x128xf32>
    %c1_38 = arith.constant 1 : index
    %c2_39 = arith.constant 2 : index
    %81 = memref.load %arg3[%c1_38, %c2_39] : memref<3x3xf32, #tpu.memory_space<smem>>
    %82 = vector.broadcast %81 : f32 to vector<1x128xf32>
    %83 = arith.mulf %82, %52 : vector<1x128xf32>
    %84 = arith.addf %80, %83 : vector<1x128xf32>
    %c1_40 = arith.constant 1 : index
    %85 = memref.load %arg4[%c1_40] : memref<3xf32, #tpu.memory_space<smem>>
    %86 = vector.broadcast %85 : f32 to vector<1x128xf32>
    %87 = arith.addf %84, %86 : vector<1x128xf32>
    %cst_41 = arith.constant 5.000000e-01 : f32
    %88 = vector.broadcast %cst_41 : f32 to vector<1x128xf32>
    %89 = arith.mulf %88, %87 : vector<1x128xf32>
    %90 = math.tanh %89 : vector<1x128xf32>
    %cst_42 = arith.constant 1.000000e+00 : f32
    %91 = vector.broadcast %cst_42 : f32 to vector<1x128xf32>
    %92 = arith.addf %90, %91 : vector<1x128xf32>
    %cst_43 = arith.constant 5.000000e-01 : f32
    %93 = vector.broadcast %cst_43 : f32 to vector<1x128xf32>
    %94 = arith.mulf %93, %92 : vector<1x128xf32>
    %c2_44 = arith.constant 2 : index
    %c0_45 = arith.constant 0 : index
    %95 = memref.load %arg3[%c2_44, %c0_45] : memref<3x3xf32, #tpu.memory_space<smem>>
    %96 = vector.broadcast %95 : f32 to vector<1x128xf32>
    %97 = arith.mulf %96, %18 : vector<1x128xf32>
    %c2_46 = arith.constant 2 : index
    %c1_47 = arith.constant 1 : index
    %98 = memref.load %arg3[%c2_46, %c1_47] : memref<3x3xf32, #tpu.memory_space<smem>>
    %99 = vector.broadcast %98 : f32 to vector<1x128xf32>
    %100 = arith.mulf %99, %35 : vector<1x128xf32>
    %101 = arith.addf %97, %100 : vector<1x128xf32>
    %c2_48 = arith.constant 2 : index
    %c2_49 = arith.constant 2 : index
    %102 = memref.load %arg3[%c2_48, %c2_49] : memref<3x3xf32, #tpu.memory_space<smem>>
    %103 = vector.broadcast %102 : f32 to vector<1x128xf32>
    %104 = arith.mulf %103, %52 : vector<1x128xf32>
    %105 = arith.addf %101, %104 : vector<1x128xf32>
    %c2_50 = arith.constant 2 : index
    %106 = memref.load %arg4[%c2_50] : memref<3xf32, #tpu.memory_space<smem>>
    %107 = vector.broadcast %106 : f32 to vector<1x128xf32>
    %108 = arith.addf %105, %107 : vector<1x128xf32>
    %cst_51 = arith.constant 5.000000e-01 : f32
    %109 = vector.broadcast %cst_51 : f32 to vector<1x128xf32>
    %110 = arith.mulf %109, %108 : vector<1x128xf32>
    %111 = math.tanh %110 : vector<1x128xf32>
    %cst_52 = arith.constant 1.000000e+00 : f32
    %112 = vector.broadcast %cst_52 : f32 to vector<1x128xf32>
    %113 = arith.addf %111, %112 : vector<1x128xf32>
    %cst_53 = arith.constant 5.000000e-01 : f32
    %114 = vector.broadcast %cst_53 : f32 to vector<1x128xf32>
    %115 = arith.mulf %114, %113 : vector<1x128xf32>
    %c0_54 = arith.constant 0 : index
    %c0_55 = arith.constant 0 : index
    %116 = memref.load %arg5[%c0_54, %c0_55] : memref<1x3xf32, #tpu.memory_space<smem>>
    %117 = vector.broadcast %116 : f32 to vector<1x128xf32>
    %118 = arith.mulf %117, %73 : vector<1x128xf32>
    %c0_56 = arith.constant 0 : index
    %c1_57 = arith.constant 1 : index
    %119 = memref.load %arg5[%c0_56, %c1_57] : memref<1x3xf32, #tpu.memory_space<smem>>
    %120 = vector.broadcast %119 : f32 to vector<1x128xf32>
    %121 = arith.mulf %120, %94 : vector<1x128xf32>
    %122 = arith.addf %118, %121 : vector<1x128xf32>
    %c0_58 = arith.constant 0 : index
    %c2_59 = arith.constant 2 : index
    %123 = memref.load %arg5[%c0_58, %c2_59] : memref<1x3xf32, #tpu.memory_space<smem>>
    %124 = vector.broadcast %123 : f32 to vector<1x128xf32>
    %125 = arith.mulf %124, %115 : vector<1x128xf32>
    %126 = arith.addf %122, %125 : vector<1x128xf32>
    %c0_60 = arith.constant 0 : index
    %127 = memref.load %arg6[%c0_60] : memref<1xf32, #tpu.memory_space<smem>>
    %128 = vector.broadcast %127 : f32 to vector<1x128xf32>
    %129 = arith.addf %126, %128 : vector<1x128xf32>
    %cst_61 = arith.constant 5.000000e-01 : f32
    %130 = vector.broadcast %cst_61 : f32 to vector<1x128xf32>
    %131 = arith.mulf %130, %129 : vector<1x128xf32>
    %132 = math.tanh %131 : vector<1x128xf32>
    %cst_62 = arith.constant 1.000000e+00 : f32
    %133 = vector.broadcast %cst_62 : f32 to vector<1x128xf32>
    %134 = arith.addf %132, %133 : vector<1x128xf32>
    %cst_63 = arith.constant 5.000000e-01 : f32
    %135 = vector.broadcast %cst_63 : f32 to vector<1x128xf32>
    %136 = arith.mulf %135, %134 : vector<1x128xf32>
    %c0_64 = arith.constant 0 : index
    %c0_65 = arith.constant 0 : index
    %137 = vector.load %arg8[%c0_64, %c0_65] : memref<1x128xf32, #tpu.memory_space<vmem>>, vector<1x128xf32>
    tpu.vector_store %arg8[%c0_64, %c0_65], %136 {strides = array<i32>} : memref<1x128xf32, #tpu.memory_space<vmem>>, vector<1x128xf32>,
    return
  }
  func.func @transform_0(%arg0: i32) -> (i32, i32) {
    %c0_i32 = arith.constant 0 : i32
    %c0_i32_0 = arith.constant 0 : i32
    %c0_i32_1 = arith.constant 0 : i32
    return %c0_i32, %c0_i32_0 : i32, i32
  }
  func.func @transform_1(%arg0: i32) -> i32 {
    %c0_i32 = arith.constant 0 : i32
    %c0_i32_0 = arith.constant 0 : i32
    return %c0_i32 : i32
  }
  func.func @transform_2(%arg0: i32) -> (i32, i32) {
    %c0_i32 = arith.constant 0 : i32
    %c0_i32_0 = arith.constant 0 : i32
    %c0_i32_1 = arith.constant 0 : i32
    return %c0_i32, %c0_i32_0 : i32, i32
  }
  func.func @transform_3(%arg0: i32) -> i32 {
    %c0_i32 = arith.constant 0 : i32
    %c0_i32_0 = arith.constant 0 : i32
    return %c0_i32 : i32
  }
  func.func @transform_4(%arg0: i32) -> (i32, i32) {
    %c0_i32 = arith.constant 0 : i32
    %c0_i32_0 = arith.constant 0 : i32
    %c0_i32_1 = arith.constant 0 : i32
    return %c0_i32, %c0_i32_0 : i32, i32
  }
  func.func @transform_5(%arg0: i32) -> i32 {
    %c0_i32 = arith.constant 0 : i32
    %c0_i32_0 = arith.constant 0 : i32
    return %c0_i32 : i32
  }
  func.func @transform_6(%arg0: i32) -> (i32, i32) {
    %c0_i32 = arith.constant 0 : i32
    %c0_i32_0 = arith.constant 0 : i32
    return %c0_i32, %arg0 : i32, i32
  }
  func.func @transform_7(%arg0: i32) -> (i32, i32) {
    %c0_i32 = arith.constant 0 : i32
    %c0_i32_0 = arith.constant 0 : i32
    return %c0_i32, %arg0 : i32, i32
  }
}

</mosaic_0001>

<bundles_post_ra>
// kernel: tpu_custom_call.1
= control target key start
LH: loop header
LB: loop body
LE: loop exit
PB: predicated region body
PF: predicated region fallthrough
CT: control target
= control target key end

     0   :  { %13 = vsyncpa [#allocation5], 0  ;;  %s453_s0 = inlined_call_operand.vmem [shape: f32[3,2], index: 0, kind: input, shape index: {}]   ;;  %s454_s1 = inlined_call_operand.vmem [shape: f32[3], index: 1, kind: input, shape index: {}]   ;;  %s455_s2 = inlined_call_operand.vmem [shape: f32[3,3], index: 2, kind: input, shape index: {}]   ;;  %s456_s3 = inlined_call_operand.vmem [shape: f32[3], index: 3, kind: input, shape index: {}]   ;;  %s457_s4 = inlined_call_operand.vmem [shape: f32[1,3], index: 4, kind: input, shape index: {}]   ;;  %s458_s5 = inlined_call_operand.<no memory space> [shape: f32[1], index: 5, kind: input, shape index: {}]   ;;  %s459_s6 = inlined_call_operand.vmem [shape: f32[2,128], index: 6, kind: input, shape index: {}]   ;;  %s460_s7 = inlined_call_operand.hbm [shape: f32[1,128], index: 7, kind: output, shape index: {}]  }
   0x1   :  { %14 = vsyncpa [#allocation7], 0 }
   0x2   :  { %15 = vsyncpa [#allocation10], 0  ;;  %s33_s26 = sshll.u32 %s454_s1, 4  ;;  %s34_s26 = int_to_ptr.vmem [resolvable:$true] %s33_s26 }
   0x3   :  { %16 = vsyncpa [#allocation4], 0  ;;  %s53_s29 = sshll.u32 %s456_s3, 4  ;;  %s260_s30 = scalar_lea.vmem %s34_s26, 16  ;;  %s54_s29 = int_to_ptr.vmem [resolvable:$true] %s53_s29 }
   0x4   :  { %p261_p0 = scmp.ne.s32.totalorder %s34_s26, %s260_s30  ;;  %p265_p1 = scmp.lt.s32.totalorder %s34_s26, %s34_s26 }
   0x5   :  { %p266_p2 = scmp.lt.s32.totalorder %s260_s30, %s260_s30 }
   0x7   :  { %p267_p3 = por %p266_p2, %p265_p1 }
   0x9   :  { %p268_p4 = pnand %p267_p3, %p261_p0 }
   0xb   :  { %271 = shalt.err (!%p268_p4)
}
   0xc   :  { %s350_s8 = smov [#allocation6]   ;;  %s272_s9 = scalar_lea.vmem %s54_s29, 16 }
   0xd   :  { %36 = dma.vmem_to_smem %s34_s26, 16, %s350_s8, [#allocation7]  }
   0xe   :  { %p273_p5 = scmp.ne.s32.totalorder %s54_s29, %s272_s9  ;;  %p277_p6 = scmp.lt.s32.totalorder %s54_s29, %s54_s29 }
   0xf   :  { %p278_p7 = scmp.lt.s32.totalorder %s272_s9, %s272_s9 }
  0x11   :  { %p279_p8 = por %p278_p7, %p277_p6 }
  0x13   :  { %p280_p9 = pnand %p279_p8, %p273_p5 }
  0x15   :  { %283 = shalt.err (!%p280_p9)
}
  0x16   :  { %s351_s1 = smov [#allocation9]   ;;  %s23_s11 = sshll.u32 %s453_s0, 4  ;;  %s24_s11 = int_to_ptr.vmem [resolvable:$true] %s23_s11 }
  0x17   :  { %56 = dma.vmem_to_smem %s54_s29, 16, %s351_s1, [#allocation10]  }
  0x18   :  { %s43_s14 = sshll.u32 %s455_s2, 4  ;;  %s284_s15 = scalar_lea.vmem %s24_s11, 64  ;;  %s44_s14 = int_to_ptr.vmem [resolvable:$true] %s43_s14 }
  0x19   :  { %p285_p10 = scmp.ne.s32.totalorder %s24_s11, %s284_s15  ;;  %p289_p11 = scmp.lt.s32.totalorder %s24_s11, %s24_s11 }
  0x1a   :  { %p290_p12 = scmp.lt.s32.totalorder %s284_s15, %s284_s15 }
  0x1c   :  { %p291_p13 = por %p290_p12, %p289_p11 }
  0x1e   :  { %p292_p0 = pnand %p291_p13, %p285_p10 }
  0x20   :  { %295 = shalt.err (!%p292_p0)
}
  0x21   :  { %s352_s16 = smov [#allocation3]   ;;  %s296_s17 = scalar_lea.vmem %s44_s14, 64 }
  0x22   :  { %26 = dma.vmem_to_smem %s24_s11, 64, %s352_s16, [#allocation5]  }
  0x23   :  { %p297_p1 = scmp.ne.s32.totalorder %s44_s14, %s296_s17  ;;  %p301_p2 = scmp.lt.s32.totalorder %s44_s14, %s44_s14 }
  0x24   :  { %p302_p3 = scmp.lt.s32.totalorder %s296_s17, %s296_s17 }
  0x26   :  { %p303_p4 = por %p302_p3, %p301_p2 }
  0x28   :  { %p304_p5 = pnand %p303_p4, %p297_p1 }
  0x2a   :  { %307 = shalt.err (!%p304_p5)
}
  0x2b   :  { %s353_s0 = smov [#allocation8]   ;;  %s63_s19 = sshll.u32 %s457_s4, 4  ;;  %s64_s19 = int_to_ptr.vmem [resolvable:$true] %s63_s19 }
  0x2c   :  { %46 = dma.vmem_to_smem %s44_s14, 64, %s353_s0, [#allocation7]  }
  0x2d   :  { %s308_s20 = scalar_lea.vmem %s64_s19, 16  ;;  %p313_p7 = scmp.lt.s32.totalorder %s64_s19, %s64_s19 }
  0x2e   :  { %p309_p6 = scmp.ne.s32.totalorder %s64_s19, %s308_s20  ;;  %p314_p8 = scmp.lt.s32.totalorder %s308_s20, %s308_s20 }
  0x30   :  { %p315_p9 = por %p314_p8, %p313_p7 }
  0x32   :  { %p316_p10 = pnand %p315_p9, %p309_p6 }
  0x34   :  { %319 = shalt.err (!%p316_p10)
}
  0x35   :  { %s354_s21 = smov [#allocation11]  }
  0x36   :  { %66 = dma.vmem_to_smem %s64_s19, 16, %s354_s21, [#allocation10]  }
  0x37   :  { %342 = dma.done.wait [#allocation5], 64  }
  0x38   :  { %343 = vsyncadd [#allocation5], 4294967232 }
  0x39   :  { %344 = dma.done.wait [#allocation7], 80  }
  0x3a   :  { %345 = vsyncadd [#allocation7], 4294967216 }
  0x3b   :  { %346 = dma.done.wait [#allocation10], 32  }
  0x3c   :  { %347 = vsyncadd [#allocation10], 4294967264 }
  0x3d   :  { %86 = sfence }
  0x3e   :  { %s89_s22 = sld [smem:[#allocation3]]  ;;  %s221_s23 = sld [smem:[#allocation3 + $0x1]]  ;;  %v87_v0 = vld [vmem:[%s459_s6] sm:$0x1]  ;;  %v88_v1 = vld [vmem:[%s459_s6 + $0x1] sm:$0x1] }
  0x3f   :  { %s96_s4 = sld [smem:[#allocation6]]  ;;  %s223_s25 = sld [smem:[#allocation3 + $0x81]] }
  0x40   :  { %s222_s24 = sld [smem:[#allocation3 + $0x80]]  ;;  %s224_s26 = sld [smem:[#allocation6 + $0x1]] }
  0x41   :  { %s225_s27 = sld [smem:[#allocation3 + $0x100]]  ;;  %s226_s30 = sld [smem:[#allocation3 + $0x101]] }
  0x42   :  { %s227_s8 = sld [smem:[#allocation6 + $0x2]]  ;;  %s131_s6 = sld [smem:[#allocation8]] }
  0x43   :  { %s417_s3 = sld [smem:[#allocation8 + $0x1]]  ;;  %s230_s10 = sld [smem:[#allocation8 + $0x80]] }
  0x44   :  { %v90_v2 = vstv %s89_s22  ;;  %v93_v4 = vstv %s221_s23  ;;  %s234_s11 = sld [smem:[#allocation8 + $0x100]]  ;;  %s231_s12 = sld [smem:[#allocation8 + $0x81]] }
  0x45   :  { %v91_v3 = vmul.f32 %v90_v2, %v87_v0  ;;  %v94_v5 = vmul.f32 %v93_v4, %v88_v1  ;;  %v107_v7 = vstv %s223_s25  ;;  %v97_v8 = vstv %s96_s4  ;;  %s235_s13 = sld [smem:[#allocation8 + $0x101]]  ;;  %s419_s14 = sld [smem:[#allocation8 + $0x2]] }
  0x46   :  { %v104_v6 = vstv %s222_s24  ;;  %v108_v10 = vmul.f32 %v107_v7, %v88_v1  ;;  %v111_v13 = vstv %s224_s26  ;;  %s421_s15 = sld [smem:[#allocation8 + $0x82]]  ;;  %s425_s17 = sld [smem:[#allocation9]] }
  0x47   :  { %v105_v9 = vmul.f32 %v104_v6, %v87_v0  ;;  %v118_v11 = vstv %s225_s27  ;;  %v95_v12 = vadd.f32 %v94_v5, %v91_v3  ;;  %v121_v15 = vstv %s226_s30  ;;  %s423_s16 = sld [smem:[#allocation8 + $0x102]]  ;;  %s427_s0 = sld [smem:[#allocation9 + $0x1]] }
  0x48   :  { %v119_v14 = vmul.f32 %v118_v11, %v87_v0  ;;  %v122_v17 = vmul.f32 %v121_v15, %v88_v1  ;;  %v125_v19 = vstv %s227_s8  ;;  %v132_v30 = vstv %s131_s6  ;;  %s429_s2 = sld [smem:[#allocation9 + $0x2]]  ;;  %s185_s18 = sld [smem:[#allocation11]] }
  0x49   :  { %v109_v16 = vadd.f32 %v108_v10, %v105_v9  ;;  %v98_v18 = vadd.f32 %v97_v8, %v95_v12  ;;  %v150_v31 = vstv %s230_s10  ;;  %v135_v35 = vstv %s417_s3  ;;  %s238_s19 = sld [smem:[#allocation11 + $0x1]]  ;;  %s239_s20 = sld [smem:[#allocation11 + $0x2]] }
  0x4a   :  { %v123_v21 = vadd.f32 %v122_v17, %v119_v14  ;;  %v168_v32 = vstv %s234_s11  ;;  %v153_v36 = vstv %s231_s12  ;;  %s355_s23 = smov [#allocation12]  }
  0x4b   :  { %v112_v20 = vadd.f32 %v111_v13, %v109_v16  ;;  %v99_v22 = vmul.f32 0.5, %v98_v18  ;;  %v171_v37 = vstv %s235_s13  ;;  %v139_v40 = vstv %s419_s14  ;;  %s210_s4 = sshll.u32 %s355_s23, 4  ;;  %s211_s4 = int_to_ptr.vmem [resolvable:$true] %s210_s4 }
  0x4c   :  { %v126_v24 = vadd.f32 %v125_v19, %v123_v21  ;;  %v157_v41 = vstv %s421_s15  ;;  %v143_v54 = vstv %s425_s17  ;;  %s320_s24 = scalar_lea.vmem %s211_s4, 16  ;;  %s324_s25 = scalar_lea.vmem %s211_s4, 32 }
  0x4d   :  { %v113_v23 = vmul.f32 0.5, %v112_v20  ;;  %246 = vtanh.f32 %v99_v22  ;;  %v175_v45 = vstv %s423_s16  ;;  %v161_v55 = vstv %s427_s0  ;;  %p321_p11 = scmp.ne.s32.totalorder %s211_s4, %s320_s24  ;;  %p325_p12 = scmp.lt.s32.totalorder %s211_s4, %s211_s4 }
  0x4e   :  { %v127_v25 = vmul.f32 0.5, %v126_v24  ;;  %v179_v60 = vstv %s429_s2  ;;  %v186_v9 = vstv %s185_s18  ;;  %v197_v20 = vstv %s458_s5  ;;  %p326_p13 = scmp.lt.s32.totalorder %s324_s25, %s320_s24 }
  0x4f   :  { %248 = vtanh.f32 %v113_v23  ;;  %v189_v12 = vstv %s238_s19  ;;  %v193_v14 = vstv %s239_s20 }
  0x50   :  { %250 = vtanh.f32 %v127_v25  ;;  %p327_p0 = por %p326_p13, %p325_p12 }
  0x52   :  { %p328_p1 = pnand %p327_p0, %p321_p11 }
  0x57   :  { %v247_v26 = vpop.eup %246 }
  0x58   :  { %v101_v28 = vadd.f32 1.0, %v247_v26 }
  0x59   :  { %v249_v27 = vpop.eup %248 }
  0x5a   :  { %v115_v29 = vadd.f32 1.0, %v249_v27  ;;  %v251_v33 = vpop.eup %250  ;;  %v102_v34 = vmul.f32 0.5, %v101_v28 }
  0x5b   :  { %v129_v39 = vadd.f32 1.0, %v251_v33 }
  0x5c   :  { %v116_v38 = vmul.f32 0.5, %v115_v29  ;;  %v133_v42 = vmul.f32 %v132_v30, %v102_v34  ;;  %v151_v43 = vmul.f32 %v150_v31, %v102_v34  ;;  %v169_v44 = vmul.f32 %v168_v32, %v102_v34 }
  0x5d   :  { %v130_v46 = vmul.f32 0.5, %v129_v39 }
  0x5e   :  { %v136_v47 = vmul.f32 %v135_v35, %v116_v38  ;;  %v154_v48 = vmul.f32 %v153_v36, %v116_v38  ;;  %v172_v49 = vmul.f32 %v171_v37, %v116_v38 }
  0x5f   :  { %v140_v51 = vmul.f32 %v139_v40, %v130_v46  ;;  %v158_v53 = vmul.f32 %v157_v41, %v130_v46  ;;  %v176_v57 = vmul.f32 %v175_v45, %v130_v46 }
  0x60   :  { %v137_v50 = vadd.f32 %v136_v47, %v133_v42  ;;  %v155_v52 = vadd.f32 %v154_v48, %v151_v43  ;;  %v173_v56 = vadd.f32 %v172_v49, %v169_v44 }
  0x62   :  { %v141_v58 = vadd.f32 %v140_v51, %v137_v50  ;;  %v159_v59 = vadd.f32 %v158_v53, %v155_v52  ;;  %v177_v61 = vadd.f32 %v176_v57, %v173_v56 }
  0x64   :  { %v144_v62 = vadd.f32 %v143_v54, %v141_v58  ;;  %v162_v63 = vadd.f32 %v161_v55, %v159_v59  ;;  %v180_v0 = vadd.f32 %v179_v60, %v177_v61 }
  0x66   :  { %v145_v1 = vmul.f32 0.5, %v144_v62  ;;  %v163_v2 = vmul.f32 0.5, %v162_v63  ;;  %v181_v3 = vmul.f32 0.5, %v180_v0 }
  0x68   :  { %252 = vtanh.f32 %v145_v1 }
  0x69   :  { %254 = vtanh.f32 %v163_v2 }
  0x6a   :  { %256 = vtanh.f32 %v181_v3 }
  0x72   :  { %v253_v4 = vpop.eup %252 }
  0x73   :  { %v255_v5 = vpop.eup %254  ;;  %v147_v6 = vadd.f32 1.0, %v253_v4 }
  0x74   :  { %v257_v7 = vpop.eup %256  ;;  %v165_v8 = vadd.f32 1.0, %v255_v5 }
  0x75   :  { %v148_v10 = vmul.f32 0.5, %v147_v6  ;;  %v183_v11 = vadd.f32 1.0, %v257_v7 }
  0x76   :  { %v166_v13 = vmul.f32 0.5, %v165_v8 }
  0x77   :  { %v184_v15 = vmul.f32 0.5, %v183_v11  ;;  %v187_v16 = vmul.f32 %v186_v9, %v148_v10 }
  0x78   :  { %v190_v17 = vmul.f32 %v189_v12, %v166_v13 }
  0x79   :  { %v194_v18 = vmul.f32 %v193_v14, %v184_v15 }
  0x7a   :  { %v191_v19 = vadd.f32 %v190_v17, %v187_v16 }
  0x7c   :  { %v195_v21 = vadd.f32 %v194_v18, %v191_v19 }
  0x7e   :  { %v198_v22 = vadd.f32 %v197_v20, %v195_v21 }
  0x80   :  { %v199_v23 = vmul.f32 0.5, %v198_v22 }
  0x82   :  { %258 = vtanh.f32 %v199_v23 }
  0x8c   :  { %v259_v24 = vpop.eup %258 }
  0x8d   :  { %v201_v25 = vadd.f32 1.0, %v259_v24 }
  0x8f   :  { %v202_v26 = vmul.f32 0.5, %v201_v25 }
  0x91   :  { %203 = vst [vmem:[#allocation12] sm:$0x1] %v202_v26 }
  0x92   :  { %331 = shalt.err (!%p328_p1)
}
  0x93   :  { %s332_s27 = scalar_lea.hbm %s460_s7, 16 }
  0x94   :  { %p333_p2 = scmp.ne.s32.totalorder %s460_s7, %s332_s27  ;;  %p336_p3 = scmp.lt.u32.totalorder %s332_s27, %s460_s7 }
  0x96   :  { %p338_p4 = pnand %p336_p3, %p333_p2 }
  0x98   :  { %341 = shalt.err (!%p338_p4)
}
  0x99   :  { %213 = dma.vmem_to_hbm [thread:$0]  %s211_s4, 16, %s460_s7, [#allocation4]  }
  0x9a   :  { %348 = dma.done.wait [#allocation4], 16  }
  0x9b   :  { %349 = vsyncadd [#allocation4], 4294967280 }
  0x9c   :  { %217 = vsyncpa [#allocation4], 1 }
  0x9d   :  { %218 = vsyncpa [#allocation5], 1 }
  0x9e   :  { %219 = vsyncpa [#allocation7], 1 }
  0x9f   :  { %220 = vsyncpa [#allocation10], 1 }

</bundles_post_ra>
